<compile_context>
chip_gen: v6e
topology: v6e:2x2x1
jax: 0.10.0
libtpu: 0.0.40
codegen_flags: <defaults>
</compile_context>

<pallas_src>
import functools

import jax
import jax.numpy as jnp
from jax.experimental import pallas as pl
from jax.experimental.pallas import tpu as pltpu


def _ffn_kernel(x_ref, w1_ref, b1_ref, w2_ref, b2_ref, o_ref, *, compute_dtype):
    # x_ref : (C_in, tl)     -- one batch element, one L tile (L on lanes)
    # w1_ref: (C_out, C_in)   b1_ref: (C_out, 1)  (f32)
    # w2_ref: (C_out, C_out)  b2_ref: (C_out, 1)  (f32)
    # o_ref : (C_out, tl)
    x = x_ref[...].astype(compute_dtype)
    h = jnp.dot(w1_ref[...], x, preferred_element_type=jnp.float32) + b1_ref[...]
    h = jnp.maximum(h, 0.0)                      # ReLU
    # Dropout (eval mode) == identity.
    y = (jnp.dot(w2_ref[...], h.astype(compute_dtype),
                 preferred_element_type=jnp.float32) + b2_ref[...])
    o_ref[...] = y.astype(o_ref.dtype)


def _vmem_limit_bytes():
    """Explicit VMEM limit; conservative fallback assumes v7x (64 MiB physical)."""
    try:
        phys = int(pltpu.get_tpu_info().vmem_capacity_bytes)
    except Exception:
        phys = 64 * 1024 * 1024
    # Leave headroom below physical capacity.
    return min(int(phys * 0.85), 112 * 1024 * 1024)


def _select_tl(L, N, per_col_bytes, weight_bytes, tile_budget):
    """Pick the L tile: big as the VMEM budget allows, multiple of 128 (or == L),
    preferring tiles that divide L so no pad/slice HBM traffic is needed."""
    avail = max(tile_budget - weight_bytes, 128 * per_col_bytes)
    tl_cap = max(128, min(2048, (avail // per_col_bytes) // 128 * 128))
    if N == 1 and L >= 256:
        # v7x megacore balance: keep >= 2 grid steps so both TensorCores get work.
        tl_cap = max(128, min(tl_cap, pl.cdiv(pl.cdiv(L, 2), 128) * 128))
    if L <= tl_cap:
        return L                                  # single full-dim tile, no padding
    for cand in range(int(tl_cap), 127, -128):    # multiple of 128 dividing L -> no pad
        if L % cand == 0:
            return cand
    return int(tl_cap)                            # last resort: pad + slice


def fc_feedforward(x_ncl, w1, b1, w2, b2, *, tl=None, compute_dtype=None):
    """x_ncl: (N, C_in, L); w1: (C_out, C_in); b1: (C_out,);
       w2: (C_out, C_out); b2: (C_out,). Returns (N, C_out, L).

    Notes: tl (if given) must be a multiple of 128 or equal to L. C_out should
    be a multiple of 8 for clean sublane tiling; for C < 128 the kernel is
    HBM-bound and the MXU is mostly padding (expected)."""
    N, C_in, L = x_ncl.shape
    C_out = w1.shape[0]
    dtype = x_ncl.dtype
    itemsize = jnp.dtype(dtype).itemsize

    # bf16 MXU path only pays off when the matmuls dominate (large C); for small
    # C the kernel is HBM-bound and f32 keeps exact numerics.
    if compute_dtype is None:
        compute_dtype = (jnp.bfloat16
                         if (dtype == jnp.float32 and min(C_in, C_out) >= 512)
                         else dtype)
    w_itemsize = jnp.dtype(compute_dtype).itemsize

    # VMEM accounting (per L column): double-buffered x + out tiles, f32
    # intermediate h and f32 y before the output cast. Weights single-buffered.
    per_col_bytes = 2 * C_in * itemsize + 2 * C_out * itemsize + 8 * C_out
    weight_bytes = (C_out * C_in + C_out * C_out) * w_itemsize + 2 * C_out * 4

    vmem_limit = _vmem_limit_bytes()
    tile_budget = vmem_limit - 4 * 1024 * 1024    # slack for compiler scratch

    if tl is None:
        tl = _select_tl(L, N, per_col_bytes, weight_bytes, tile_budget)
    else:
        if not (tl == L or (tl > 0 and tl % 128 == 0)):
            raise ValueError(f"tl={tl} must be a multiple of 128 or equal to L={L}")

    n_l = pl.cdiv(L, tl)
    L_pad = n_l * tl
    if L_pad != L:
        # Zero-pad L; each output column depends only on its own input column,
        # so padding cannot contaminate valid outputs. Sliced off below.
        x_ncl = jnp.pad(x_ncl, ((0, 0), (0, 0), (0, L_pad - L)))

    # Wrapper-side one-time weight cast (tiny); biases kept f32 for exact
    # addition into the f32 accumulator.
    w1_c = w1.astype(compute_dtype)
    w2_c = w2.astype(compute_dtype)
    b1_r = b1.reshape(C_out, 1).astype(jnp.float32)
    b2_r = b2.reshape(C_out, 1).astype(jnp.float32)

    flops = 2 * N * L_pad * C_out * (C_in + C_out)
    bytes_accessed = (
        N * C_in * L_pad * itemsize                       # x
        + w1_c.size * w_itemsize + w2_c.size * w_itemsize
        + b1_r.size * 4 + b2_r.size * 4
        + N * C_out * L_pad * itemsize)                   # y

    kernel = functools.partial(_ffn_kernel, compute_dtype=compute_dtype)

    def build(weight_pipeline_mode):
        wkw = ({} if weight_pipeline_mode is None
               else {"pipeline_mode": weight_pipeline_mode})
        return pl.pallas_call(
            kernel,
            out_shape=jax.ShapeDtypeStruct((N, C_out, L_pad), dtype),
            grid_spec=pltpu.PrefetchScalarGridSpec(
                num_scalar_prefetch=0,
                grid=(N, n_l),
                in_specs=[
                    pl.BlockSpec((None, C_in, tl), lambda n, l: (n, 0, l)),
                    pl.BlockSpec((C_out, C_in), lambda n, l: (0, 0), **wkw),
                    pl.BlockSpec((C_out, 1), lambda n, l: (0, 0), **wkw),
                    pl.BlockSpec((C_out, C_out), lambda n, l: (0, 0), **wkw),
                    pl.BlockSpec((C_out, 1), lambda n, l: (0, 0), **wkw),
                ],
                out_specs=pl.BlockSpec((None, C_out, tl), lambda n, l: (n, 0, l)),
            ),
            compiler_params=pltpu.CompilerParams(
                dimension_semantics=("parallel", "parallel"),
                vmem_limit_bytes=vmem_limit),
            cost_estimate=pl.CostEstimate(
                flops=flops, transcendentals=0, bytes_accessed=bytes_accessed),
        )

    args = (x_ncl, w1_c, b1_r, w2_c, b2_r)
    out = None
    try:
        # Single-buffer the constant weight/bias blocks (fetched once anyway):
        # halves resident weight VMEM, freeing headroom for larger L tiles.
        out = build(pl.Buffered(1))(*args)
    except Exception:
        out = None
    if out is None:
        out = build(None)(*args)    # fallback: default (double-buffered) pipeline

    return out[:, :, :L] if L_pad != L else out


def _reference(x_ncl, w1, b1, w2, b2):
    # Pure-JAX reference of Conv1d(k=1) -> ReLU -> Conv1d(k=1), eval-mode dropout.
    h = jnp.einsum("ncl,oc->nol", x_ncl, w1) + b1[None, :, None]
    h = jnp.maximum(h, 0.0)
    y = jnp.einsum("ncl,oc->nol", h, w2) + b2[None, :, None]
    return y


if __name__ == "__main__":
    N, C_in, C_out, L = 2, 4, 8, 16

    key = jax.random.PRNGKey(0)
    kx, k1, k2, k3, k4 = jax.random.split(key, 5)

    x = jax.random.normal(kx, (N, C_in, L), dtype=jnp.float32)
    # Deterministic synthetic parameters (same shapes as nn.Conv1d(., ., 1)).
    w1 = jax.random.normal(k1, (C_out, C_in), dtype=jnp.float32) * 0.1
    b1 = jax.random.normal(k2, (C_out,), dtype=jnp.float32) * 0.1
    w2 = jax.random.normal(k3, (C_out, C_out), dtype=jnp.float32) * 0.1
    b2 = jax.random.normal(k4, (C_out,), dtype=jnp.float32) * 0.1

    out = fc_feedforward(x, w1, b1, w2, b2)
    out = jax.block_until_ready(out)

    ref = _reference(x, w1, b1, w2, b2)
    assert out.shape == (N, C_out, L)
    assert jnp.allclose(out, ref, atol=1e-5, rtol=1e-5)

    print("KERNEL_OK")
</pallas_src>

<mosaic_0001>
module attributes {stable_mosaic.version = 11 : i64} {
  func.func @_ffn_kernel(%arg0: i32, %arg1: i32, %arg2: memref<1x4x16xf32, #tpu.memory_space<vmem>>, %arg3: memref<8x4xf32, #tpu.memory_space<vmem>>, %arg4: memref<8x1xf32, #tpu.memory_space<vmem>>, %arg5: memref<8x8xf32, #tpu.memory_space<vmem>>, %arg6: memref<8x1xf32, #tpu.memory_space<vmem>>, %arg7: memref<1x8x16xf32, #tpu.memory_space<vmem>>) attributes {dimension_semantics = [#tpu.dimension_semantics<parallel>, #tpu.dimension_semantics<parallel>], iteration_bounds = array<i64: 2, 1>, scalar_prefetch = 0 : i64, scratch_operands = 0 : i64, tpu.core_type = #tpu.core_type<tc>, window_params = [{transform_indices = @transform_0, window_bounds = array<i64: 1, 4, 16>}, {pipeline_mode = #tpu.pipeline_mode<synchronous>, transform_indices = @transform_1, window_bounds = array<i64: 8, 4>}, {pipeline_mode = #tpu.pipeline_mode<synchronous>, transform_indices = @transform_2, window_bounds = array<i64: 8, 1>}, {pipeline_mode = #tpu.pipeline_mode<synchronous>, transform_indices = @transform_3, window_bounds = array<i64: 8, 8>}, {pipeline_mode = #tpu.pipeline_mode<synchronous>, transform_indices = @transform_4, window_bounds = array<i64: 8, 1>}, {transform_indices = @transform_5, window_bounds = array<i64: 1, 8, 16>}]} {
    %c0 = arith.constant 0 : index
    %c0_0 = arith.constant 0 : index
    %c0_1 = arith.constant 0 : index
    %0 = vector.load %arg2[%c0, %c0_0, %c0_1] : memref<1x4x16xf32, #tpu.memory_space<vmem>>, vector<1x4x16xf32>
    %1 = vector.shape_cast %0 : vector<1x4x16xf32> to vector<4x16xf32>
    %c0_2 = arith.constant 0 : index
    %c0_3 = arith.constant 0 : index
    %2 = vector.load %arg3[%c0_2, %c0_3] : memref<8x4xf32, #tpu.memory_space<vmem>>, vector<8x4xf32>
    %cst = arith.constant dense<0.000000e+00> : vector<8x16xf32>
    %3 = tpu.matmul %2, %1, %cst {dimension_numbers = #tpu.dot_dimension_numbers<[1], [0], [0], [1], [0, 0, 1, 1], [], []>} : vector<8x4xf32>, vector<4x16xf32>, vector<8x16xf32> -> vector<8x16xf32>
    %c0_4 = arith.constant 0 : index
    %c0_5 = arith.constant 0 : index
    %4 = vector.load %arg4[%c0_4, %c0_5] : memref<8x1xf32, #tpu.memory_space<vmem>>, vector<8x1xf32>
    %5 = vector.broadcast %4 : vector<8x1xf32> to vector<8x16xf32>
    %6 = arith.addf %3, %5 : vector<8x16xf32>
    %cst_6 = arith.constant 0.000000e+00 : f32
    %7 = vector.broadcast %cst_6 : f32 to vector<8x16xf32>
    %8 = arith.maximumf %6, %7 : vector<8x16xf32>
    %c0_7 = arith.constant 0 : index
    %c0_8 = arith.constant 0 : index
    %9 = vector.load %arg5[%c0_7, %c0_8] : memref<8x8xf32, #tpu.memory_space<vmem>>, vector<8x8xf32>
    %cst_9 = arith.constant dense<0.000000e+00> : vector<8x16xf32>
    %10 = tpu.matmul %9, %8, %cst_9 {dimension_numbers = #tpu.dot_dimension_numbers<[1], [0], [0], [1], [0, 0, 1, 1], [], []>} : vector<8x8xf32>, vector<8x16xf32>, vector<8x16xf32> -> vector<8x16xf32>
    %c0_10 = arith.constant 0 : index
    %c0_11 = arith.constant 0 : index
    %11 = vector.load %arg6[%c0_10, %c0_11] : memref<8x1xf32, #tpu.memory_space<vmem>>, vector<8x1xf32>
    %12 = vector.broadcast %11 : vector<8x1xf32> to vector<8x16xf32>
    %13 = arith.addf %10, %12 : vector<8x16xf32>
    %c0_12 = arith.constant 0 : index
    %c0_13 = arith.constant 0 : index
    %c0_14 = arith.constant 0 : index
    %14 = vector.load %arg7[%c0_12, %c0_13, %c0_14] : memref<1x8x16xf32, #tpu.memory_space<vmem>>, vector<1x8x16xf32>
    %15 = vector.shape_cast %14 : vector<1x8x16xf32> to vector<8x16xf32>
    %16 = vector.shape_cast %13 : vector<8x16xf32> to vector<1x8x16xf32>
    tpu.vector_store %arg7[%c0_12, %c0_13, %c0_14], %16 {strides = array<i32>} : memref<1x8x16xf32, #tpu.memory_space<vmem>>, vector<1x8x16xf32>,
    return
  }
  func.func @transform_0(%arg0: i32, %arg1: i32) -> (i32, i32, i32) {
    %c0_i32 = arith.constant 0 : i32
    %c0_i32_0 = arith.constant 0 : i32
    return %arg0, %c0_i32, %arg1 : i32, i32, i32
  }
  func.func @transform_1(%arg0: i32, %arg1: i32) -> (i32, i32) {
    %c0_i32 = arith.constant 0 : i32
    %c0_i32_0 = arith.constant 0 : i32
    %c0_i32_1 = arith.constant 0 : i32
    return %c0_i32, %c0_i32_0 : i32, i32
  }
  func.func @transform_2(%arg0: i32, %arg1: i32) -> (i32, i32) {
    %c0_i32 = arith.constant 0 : i32
    %c0_i32_0 = arith.constant 0 : i32
    %c0_i32_1 = arith.constant 0 : i32
    return %c0_i32, %c0_i32_0 : i32, i32
  }
  func.func @transform_3(%arg0: i32, %arg1: i32) -> (i32, i32) {
    %c0_i32 = arith.constant 0 : i32
    %c0_i32_0 = arith.constant 0 : i32
    %c0_i32_1 = arith.constant 0 : i32
    return %c0_i32, %c0_i32_0 : i32, i32
  }
  func.func @transform_4(%arg0: i32, %arg1: i32) -> (i32, i32) {
    %c0_i32 = arith.constant 0 : i32
    %c0_i32_0 = arith.constant 0 : i32
    %c0_i32_1 = arith.constant 0 : i32
    return %c0_i32, %c0_i32_0 : i32, i32
  }
  func.func @transform_5(%arg0: i32, %arg1: i32) -> (i32, i32, i32) {
    %c0_i32 = arith.constant 0 : i32
    %c0_i32_0 = arith.constant 0 : i32
    return %arg0, %c0_i32, %arg1 : i32, i32, i32
  }
}

module attributes {stable_mosaic.version = 11 : i64} {
  func.func @_ffn_kernel(%arg0: i32, %arg1: i32, %arg2: memref<1x4x16xf32, #tpu.memory_space<vmem>>, %arg3: memref<8x4xf32, #tpu.memory_space<vmem>>, %arg4: memref<8x1xf32, #tpu.memory_space<vmem>>, %arg5: memref<8x8xf32, #tpu.memory_space<vmem>>, %arg6: memref<8x1xf32, #tpu.memory_space<vmem>>, %arg7: memref<1x8x16xf32, #tpu.memory_space<vmem>>) attributes {dimension_semantics = [#tpu.dimension_semantics<parallel>, #tpu.dimension_semantics<parallel>], iteration_bounds = array<i64: 2, 1>, scalar_prefetch = 0 : i64, scratch_operands = 0 : i64, tpu.core_type = #tpu.core_type<tc>, window_params = [{transform_indices = @transform_0, window_bounds = array<i64: 1, 4, 16>}, {pipeline_mode = #tpu.pipeline_mode<synchronous>, transform_indices = @transform_1, window_bounds = array<i64: 8, 4>}, {pipeline_mode = #tpu.pipeline_mode<synchronous>, transform_indices = @transform_2, window_bounds = array<i64: 8, 1>}, {pipeline_mode = #tpu.pipeline_mode<synchronous>, transform_indices = @transform_3, window_bounds = array<i64: 8, 8>}, {pipeline_mode = #tpu.pipeline_mode<synchronous>, transform_indices = @transform_4, window_bounds = array<i64: 8, 1>}, {transform_indices = @transform_5, window_bounds = array<i64: 1, 8, 16>}]} {
    %c0 = arith.constant 0 : index
    %c0_0 = arith.constant 0 : index
    %c0_1 = arith.constant 0 : index
    %0 = vector.load %arg2[%c0, %c0_0, %c0_1] : memref<1x4x16xf32, #tpu.memory_space<vmem>>, vector<1x4x16xf32>
    %1 = vector.shape_cast %0 : vector<1x4x16xf32> to vector<4x16xf32>
    %c0_2 = arith.constant 0 : index
    %c0_3 = arith.constant 0 : index
    %2 = vector.load %arg3[%c0_2, %c0_3] : memref<8x4xf32, #tpu.memory_space<vmem>>, vector<8x4xf32>
    %cst = arith.constant dense<0.000000e+00> : vector<8x16xf32>
    %3 = tpu.matmul %2, %1, %cst {dimension_numbers = #tpu.dot_dimension_numbers<[1], [0], [0], [1], [0, 0, 1, 1], [], []>} : vector<8x4xf32>, vector<4x16xf32>, vector<8x16xf32> -> vector<8x16xf32>
    %c0_4 = arith.constant 0 : index
    %c0_5 = arith.constant 0 : index
    %4 = vector.load %arg4[%c0_4, %c0_5] : memref<8x1xf32, #tpu.memory_space<vmem>>, vector<8x1xf32>
    %5 = vector.broadcast %4 : vector<8x1xf32> to vector<8x16xf32>
    %6 = arith.addf %3, %5 : vector<8x16xf32>
    %cst_6 = arith.constant 0.000000e+00 : f32
    %7 = vector.broadcast %cst_6 : f32 to vector<8x16xf32>
    %8 = arith.maximumf %6, %7 : vector<8x16xf32>
    %c0_7 = arith.constant 0 : index
    %c0_8 = arith.constant 0 : index
    %9 = vector.load %arg5[%c0_7, %c0_8] : memref<8x8xf32, #tpu.memory_space<vmem>>, vector<8x8xf32>
    %cst_9 = arith.constant dense<0.000000e+00> : vector<8x16xf32>
    %10 = tpu.matmul %9, %8, %cst_9 {dimension_numbers = #tpu.dot_dimension_numbers<[1], [0], [0], [1], [0, 0, 1, 1], [], []>} : vector<8x8xf32>, vector<8x16xf32>, vector<8x16xf32> -> vector<8x16xf32>
    %c0_10 = arith.constant 0 : index
    %c0_11 = arith.constant 0 : index
    %11 = vector.load %arg6[%c0_10, %c0_11] : memref<8x1xf32, #tpu.memory_space<vmem>>, vector<8x1xf32>
    %12 = vector.broadcast %11 : vector<8x1xf32> to vector<8x16xf32>
    %13 = arith.addf %10, %12 : vector<8x16xf32>
    %c0_12 = arith.constant 0 : index
    %c0_13 = arith.constant 0 : index
    %c0_14 = arith.constant 0 : index
    %14 = vector.load %arg7[%c0_12, %c0_13, %c0_14] : memref<1x8x16xf32, #tpu.memory_space<vmem>>, vector<1x8x16xf32>
    %15 = vector.shape_cast %14 : vector<1x8x16xf32> to vector<8x16xf32>
    %16 = vector.shape_cast %13 : vector<8x16xf32> to vector<1x8x16xf32>
    tpu.vector_store %arg7[%c0_12, %c0_13, %c0_14], %16 {strides = array<i32>} : memref<1x8x16xf32, #tpu.memory_space<vmem>>, vector<1x8x16xf32>,
    return
  }
  func.func @transform_0(%arg0: i32, %arg1: i32) -> (i32, i32, i32) {
    %c0_i32 = arith.constant 0 : i32
    %c0_i32_0 = arith.constant 0 : i32
    return %arg0, %c0_i32, %arg1 : i32, i32, i32
  }
  func.func @transform_1(%arg0: i32, %arg1: i32) -> (i32, i32) {
    %c0_i32 = arith.constant 0 : i32
    %c0_i32_0 = arith.constant 0 : i32
    %c0_i32_1 = arith.constant 0 : i32
    return %c0_i32, %c0_i32_0 : i32, i32
  }
  func.func @transform_2(%arg0: i32, %arg1: i32) -> (i32, i32) {
    %c0_i32 = arith.constant 0 : i32
    %c0_i32_0 = arith.constant 0 : i32
    %c0_i32_1 = arith.constant 0 : i32
    return %c0_i32, %c0_i32_0 : i32, i32
  }
  func.func @transform_3(%arg0: i32, %arg1: i32) -> (i32, i32) {
    %c0_i32 = arith.constant 0 : i32
    %c0_i32_0 = arith.constant 0 : i32
    %c0_i32_1 = arith.constant 0 : i32
    return %c0_i32, %c0_i32_0 : i32, i32
  }
  func.func @transform_4(%arg0: i32, %arg1: i32) -> (i32, i32) {
    %c0_i32 = arith.constant 0 : i32
    %c0_i32_0 = arith.constant 0 : i32
    %c0_i32_1 = arith.constant 0 : i32
    return %c0_i32, %c0_i32_0 : i32, i32
  }
  func.func @transform_5(%arg0: i32, %arg1: i32) -> (i32, i32, i32) {
    %c0_i32 = arith.constant 0 : i32
    %c0_i32_0 = arith.constant 0 : i32
    return %arg0, %c0_i32, %arg1 : i32, i32, i32
  }
}

</mosaic_0001>

<bundles_post_ra>
// kernel: tpu_custom_call.1
= control target key start
LH: loop header
LB: loop body
LE: loop exit
PB: predicated region body
PF: predicated region fallthrough
CT: control target
= control target key end

     0   :  { %10 = vsyncpa [#allocation3], 0  ;;  %s817_s0 = inlined_call_operand.vmem [shape: f32[2,4,16], index: 0, kind: input, shape index: {}]   ;;  %s818_s1 = inlined_call_operand.vmem [shape: f32[8,4], index: 1, kind: input, shape index: {}]   ;;  %s819_s2 = inlined_call_operand.vmem [shape: f32[8,1], index: 2, kind: input, shape index: {}]   ;;  %s820_s3 = inlined_call_operand.vmem [shape: f32[8,8], index: 3, kind: input, shape index: {}]   ;;  %s821_s4 = inlined_call_operand.vmem [shape: f32[8,1], index: 4, kind: input, shape index: {}]   ;;  %s822_s5 = inlined_call_operand.hbm [shape: f32[2,8,16], index: 5, kind: output, shape index: {}]  }
   0x1   :  { %12 = vsyncpa [#allocation3 + $0x1], 0  ;;  %s700_s18 = smov 0   ;;  %s702_s19 = smov 0  }
   0x2   :  { %s704_s20 = smov 0   ;;  %s706_s21 = smov 0  }
   0x3   :  { %s708_s22 = smov 0   ;;  %s710_s23 = smov 0  }
   0x4 LB: > { %s501_s24 = sadd.s32 4294967295, %s664_s23   ;;  %s502_s25 = sadd.s32 4294967294, %s664_s23   ;;  %s664_s23 = sphi %s710_s23, %s18_s23   ;;  %s660_s22 = sphi %s708_s22, %s829_s22   ;;  %s656_s21 = sphi %s706_s21, %s828_s21   ;;  %s652_s20 = sphi %s704_s20, %s827_s20   ;;  %s648_s19 = sphi %s702_s19, %s826_s19   ;;  %s644_s18 = sphi %s700_s18, %s825_s18  }
   0x5   : > { %s30_s26 = sadd.s32 1, %s660_s22  ;;  %s151_s27 = sadd.s32 1, %s652_s20 }
   0x6   : > { %p32_p0 = scmp.ge.s32.totalorder %s30_s26, 2  ;;  %p161_p1 = scmp.ne.s32.totalorder %s652_s20, %s648_s19 }
   0x7   : > { %p162_p2 = scmp.eq.s32.totalorder %s501_s24, 1  ;;  %p167_p3 = scmp.ne.s32.totalorder %s648_s19, %s644_s18 }
   0x8   : > { %s831_s26 = smov (%p32_p0, %s30_s26), 0  ;;  %p168_p5 = scmp.eq.s32.totalorder %s502_s25, 1 }
   0x9   : > { %p740_p4 = por %p162_p2, %p161_p1  ;;  %s146_s29 = ssub.s32 %s660_s22, %s831_s26 }
   0xa   : > { %p505_p6 = scmp.ge.s32.totalorder %s664_s23, 1  ;;  %p149_p7 = scmp.eq.s32.totalorder %s146_s29, 0 }
   0xb   : > { %p747_p8 = por %p168_p5, %p167_p3  ;;  %p208_p9 = scmp.lt.s32.totalorder %s664_s23, 3 }
   0xc   : > { %s753_s6 = scalar_select %p149_p7, %s652_s20, %s151_s27  }
   0xd   : > { %p209_p10 = pnand %p505_p6, %p208_p9 }
   0xe   : > { %p238_p11 = scmp.lt.s32.totalorder (!%p209_p10), %s656_s21, 1  ;;  %s235_s27 = sand.u32 (!%p209_p10), 1, %s648_s19  }
   0xf   : > { %212 = sbr.rel (%p209_p10) target bundleno = 432 (0x1b0), region = 40  ;;  %s506_s29 = sshll.u32 (!%p209_p10), %s235_s27, 3 }
  0x10   : > { %s512_s7 = sshll.u32 (!%p209_p10), %s656_s21, 7  ;;  %s237_s8 = scalar_lea.vmem (!%p209_p10), [#allocation2], %s506_s29 }
  0x11   : > { %s777_s12 = scalar_lea.hbm (!%p209_p10), %s822_s5, %s512_s7  ;;  %s416_s13 = scalar_lea.sflag (!%p209_p10), [#allocation3], %s235_s27 }
  0x14   : > { %v666_v0 = vmov 0.0   ;;  %vm667_vm0 = vmmov 0   ;;  %v247_v1 = vld [vmem:[%s819_s2] sm:$0xff]  ;;  %s239_s9 = scalar_select %p238_p11, %s656_s21, 1  ;;  %v668_v2 = vmov 0   ;;  %vm257_vm1 = vcmask 1043456  }
  0x15   : > { %519 = vmatprep.subr.mxu0 %v666_v0  ;;  %521 = vmatprep.mubr.msk.f32.mxu0 %vm667_vm0, %v666_v0  ;;  %v333_v3 = vld [vmem:[%s821_s4] sm:$0xff]  ;;  %vm253_vm2 = vcmask 31744   ;;  %vm339_vm3 = vcmask 64512   ;;  %vm413_vm4 = vcmask 130048   ;;  %s669_s21 = smov [#allocation2]  }
  0x16   : > { %587 = vset.pattern.permute.xlu0 %v668_v2  ;;  %524 = vmatprep.subr.mxu1 %v666_v0  ;;  %s507_s10 = sshll.u32 %s239_s9, 2  ;;  %v246_v4 = vld [vmem:[%s818_s1] sm:$0xff]  ;;  %s430_s9 = sshll.u32 %s237_s8, 4  ;;  %s431_s9 = int_to_ptr.vmem [resolvable:$true] %s430_s9 }
  0x17   : > { %250 = vperm.xlu0 %587, %v247_v1   ;;  %526 = vmatprep.mubr.msk.f32.mxu1 %vm667_vm0, %v666_v0  ;;  %s244_s15 = scalar_lea.vmem %s817_s0, %s507_s10  ;;  %v332_v11 = vld [vmem:[%s820_s3] sm:$0xff]  ;;  %s588_s14 = scalar_lea.vmem %s431_s9, 128 }
  0x18   : > { %v245_v5 = vld [vmem:[%s244_s15] sm:$0xf]  ;;  %p589_p12 = scmp.ne.s32.totalorder %s431_s9, %s588_s14  ;;  %s592_s15 = sshll.u32 %s669_s21, 4  ;;  %s593_s15 = int_to_ptr.vmem [resolvable:$false] %s592_s15 }
  0x19   : > { %520 = vmatpush3.msk.msra.mxu0 %vm257_vm1, %v245_v5  ;;  %s594_s16 = scalar_lea.vmem %s593_s15, 256  ;;  %p595_p1 = scmp.lt.s32.totalorder %s431_s9, %s593_s15 }
  0x1a   : > { %522 = vmatmul.mubr.msk.f32.vlgmr.msra.gmra.mxu0 %vm253_vm2, %v246_v4  ;;  %p590_p13 = pnand %p589_p12, %p740_p4  ;;  %p596_p2 = scmp.lt.s32.totalorder %s594_s16, %s588_s14 }
  0x1b   : > { %336 = vperm.xlu0 %587, %v333_v3  }
  0x1c   : > { %p591_p0 = pneg %p590_p13  ;;  %p597_p3 = por %p596_p2, %p595_p1 }
  0x1e   : > { %p598_p5 = pnand %p597_p3, %p591_p0 }
  0x92   : > { %v251_v6 = vpop.permute.xlu0 %250 }
  0x96   : > { %v337_v12 = vpop.permute.xlu0 %336 }
  0xda   : > { %v327_v7 = vpop.f32.mrf.mxu0 }
  0xdb   : > { %v328_v8 = vadd.f32 %v327_v7, %v251_v6 }
  0xdc   : > { %v523_v9 = vpop.f32.mrf.mxu0 }
  0xdd   : > { %v331_v10 = vmax.f32 %v328_v8, 0.0 }
  0xdf   : > { %525 = vmatpush3.msra.mxu1 %v331_v10 }
  0xe0   : > { %527 = vmatmul.mubr.msk.f32.vlgmr.msra.gmra.mxu1 %vm339_vm3, %v332_v11 }
 0x1a0   : > { %v409_v13 = vpop.f32.mrf.mxu1 }
 0x1a1   : > { %v410_v14 = vadd.f32 %v409_v13, %v337_v12 }
 0x1a2   : > { %v528_v15 = vpop.f32.mrf.mxu1 }
 0x1a3   : > { %414 = vst.msk [vmem:[%s237_s8] sm:$0xff] %vm413_vm4, %v410_v14 }
 0x1a4   : > { %601 = shalt.err (!%p598_p5)
}
 0x1a5   : > { %s602_s17 = scalar_lea.hbm %s777_s12, 128  ;;  %s606_s27 = scalar_lea.hbm %s822_s5, 256 }
 0x1a6   : > { %p603_p6 = scmp.ne.s32.totalorder %s777_s12, %s602_s17  ;;  %p607_p10 = scmp.lt.s32.totalorder %s777_s12, %s822_s5 }
 0x1a7   : > { %p608_p11 = scmp.lt.s32.totalorder %s606_s27, %s602_s17 }
 0x1a8   : > { %p604_p7 = pnand %p603_p6, %p740_p4 }
 0x1a9   : > { %p609_p12 = por %p608_p11, %p607_p10 }
 0x1aa   : > { %p605_p9 = pneg %p604_p7 }
 0x1ac   : > { %p610_p13 = pnand %p609_p12, %p605_p9 }
 0x1ae   : > { %613 = shalt.err (!%p610_p13)
}
 0x1af   : > { %529 = dma.vmem_to_hbm [thread:$0]  (%p740_p4), %s431_s9, 128, %s777_s12, %s416_s13  }
 0x1b0 PF: > { %p535_p0 = scmp.ge.s32.totalorder %s664_s23, 2  ;;  %s442_s8 = sand.u32 1, %s644_s18  }
 0x1b1   : > { %s443_s10 = scalar_lea.sflag [#allocation3], %s442_s8 }
 0x1b2   : > { %p532_p1 = pnand %p535_p0, %p747_p8 }
 0x1b4   : > { %p533_p2 = pneg %p532_p1 }
 0x1b6   : > { %639 = dma.done.wait (%p533_p2), %s443_s10, 128  }
 0x1b7   : > { %641 = vsyncadd (%p533_p2), %s443_s10, 4294967168  ;;  %s18_s23 = sadd.s32 1, %s664_s23   ;;  %s825_s18 = smov %s648_s19 }
 0x1b8   : > { %p15_p3 = scmp.ge.s32.totalorder %s18_s23, 4   ;;  %s826_s19 = smov %s652_s20 }
 0x1b9   : > { %s827_s20 = smov %s753_s6  ;;  %s828_s21 = smov %s660_s22 }
 0x1ba   : > { %s829_s22 = smov %s831_s26  ;;  %17 = sbr.rel (!%p15_p3) target bundleno = 4 (0x4), region = 75 }
 0x1bf   :  { %448 = vsyncpa [#allocation3], 1 }
 0x1c0   :  { %450 = vsyncpa [#allocation3 + $0x1], 1 }

// kernel: tpu_custom_call.1
= control target key start
LH: loop header
LB: loop body
LE: loop exit
PB: predicated region body
PF: predicated region fallthrough
CT: control target
= control target key end

     0   :  { %10 = vsyncpa [#allocation3], 0  ;;  %s817_s0 = inlined_call_operand.vmem [shape: f32[2,4,16], index: 0, kind: input, shape index: {}]   ;;  %s818_s1 = inlined_call_operand.vmem [shape: f32[8,4], index: 1, kind: input, shape index: {}]   ;;  %s819_s2 = inlined_call_operand.vmem [shape: f32[8,1], index: 2, kind: input, shape index: {}]   ;;  %s820_s3 = inlined_call_operand.vmem [shape: f32[8,8], index: 3, kind: input, shape index: {}]   ;;  %s821_s4 = inlined_call_operand.vmem [shape: f32[8,1], index: 4, kind: input, shape index: {}]   ;;  %s822_s5 = inlined_call_operand.hbm [shape: f32[2,8,16], index: 5, kind: output, shape index: {}]  }
   0x1   :  { %12 = vsyncpa [#allocation3 + $0x1], 0  ;;  %s700_s18 = smov 0   ;;  %s702_s19 = smov 0  }
   0x2   :  { %s704_s20 = smov 0   ;;  %s706_s21 = smov 0  }
   0x3   :  { %s708_s22 = smov 0   ;;  %s710_s23 = smov 0  }
   0x4 LB: > { %s501_s24 = sadd.s32 4294967295, %s664_s23   ;;  %s502_s25 = sadd.s32 4294967294, %s664_s23   ;;  %s664_s23 = sphi %s710_s23, %s18_s23   ;;  %s660_s22 = sphi %s708_s22, %s829_s22   ;;  %s656_s21 = sphi %s706_s21, %s828_s21   ;;  %s652_s20 = sphi %s704_s20, %s827_s20   ;;  %s648_s19 = sphi %s702_s19, %s826_s19   ;;  %s644_s18 = sphi %s700_s18, %s825_s18  }
   0x5   : > { %s30_s26 = sadd.s32 1, %s660_s22  ;;  %s151_s27 = sadd.s32 1, %s652_s20 }
   0x6   : > { %p32_p0 = scmp.ge.s32.totalorder %s30_s26, 2  ;;  %p161_p1 = scmp.ne.s32.totalorder %s652_s20, %s648_s19 }
   0x7   : > { %p162_p2 = scmp.eq.s32.totalorder %s501_s24, 1  ;;  %p167_p3 = scmp.ne.s32.totalorder %s648_s19, %s644_s18 }
   0x8   : > { %s831_s26 = smov (%p32_p0, %s30_s26), 0  ;;  %p168_p5 = scmp.eq.s32.totalorder %s502_s25, 1 }
   0x9   : > { %p740_p4 = por %p162_p2, %p161_p1  ;;  %s146_s29 = ssub.s32 %s660_s22, %s831_s26 }
   0xa   : > { %p505_p6 = scmp.ge.s32.totalorder %s664_s23, 1  ;;  %p149_p7 = scmp.eq.s32.totalorder %s146_s29, 0 }
   0xb   : > { %p747_p8 = por %p168_p5, %p167_p3  ;;  %p208_p9 = scmp.lt.s32.totalorder %s664_s23, 3 }
   0xc   : > { %s753_s6 = scalar_select %p149_p7, %s652_s20, %s151_s27  }
   0xd   : > { %p209_p10 = pnand %p505_p6, %p208_p9 }
   0xe   : > { %p238_p11 = scmp.lt.s32.totalorder (!%p209_p10), %s656_s21, 1  ;;  %s235_s27 = sand.u32 (!%p209_p10), 1, %s648_s19  }
   0xf   : > { %212 = sbr.rel (%p209_p10) target bundleno = 432 (0x1b0), region = 40  ;;  %s506_s29 = sshll.u32 (!%p209_p10), %s235_s27, 3 }
  0x10   : > { %s512_s7 = sshll.u32 (!%p209_p10), %s656_s21, 7  ;;  %s237_s8 = scalar_lea.vmem (!%p209_p10), [#allocation2], %s506_s29 }
  0x11   : > { %s777_s12 = scalar_lea.hbm (!%p209_p10), %s822_s5, %s512_s7  ;;  %s416_s13 = scalar_lea.sflag (!%p209_p10), [#allocation3], %s235_s27 }
  0x14   : > { %v666_v0 = vmov 0.0   ;;  %vm667_vm0 = vmmov 0   ;;  %v247_v1 = vld [vmem:[%s819_s2] sm:$0xff]  ;;  %s239_s9 = scalar_select %p238_p11, %s656_s21, 1  ;;  %v668_v2 = vmov 0   ;;  %vm257_vm1 = vcmask 1043456  }
  0x15   : > { %519 = vmatprep.subr.mxu0 %v666_v0  ;;  %521 = vmatprep.mubr.msk.f32.mxu0 %vm667_vm0, %v666_v0  ;;  %v333_v3 = vld [vmem:[%s821_s4] sm:$0xff]  ;;  %vm253_vm2 = vcmask 31744   ;;  %vm339_vm3 = vcmask 64512   ;;  %vm413_vm4 = vcmask 130048   ;;  %s669_s21 = smov [#allocation2]  }
  0x16   : > { %587 = vset.pattern.permute.xlu0 %v668_v2  ;;  %524 = vmatprep.subr.mxu1 %v666_v0  ;;  %s507_s10 = sshll.u32 %s239_s9, 2  ;;  %v246_v4 = vld [vmem:[%s818_s1] sm:$0xff]  ;;  %s430_s9 = sshll.u32 %s237_s8, 4  ;;  %s431_s9 = int_to_ptr.vmem [resolvable:$true] %s430_s9 }
  0x17   : > { %250 = vperm.xlu0 %587, %v247_v1   ;;  %526 = vmatprep.mubr.msk.f32.mxu1 %vm667_vm0, %v666_v0  ;;  %s244_s15 = scalar_lea.vmem %s817_s0, %s507_s10  ;;  %v332_v11 = vld [vmem:[%s820_s3] sm:$0xff]  ;;  %s588_s14 = scalar_lea.vmem %s431_s9, 128 }
  0x18   : > { %v245_v5 = vld [vmem:[%s244_s15] sm:$0xf]  ;;  %p589_p12 = scmp.ne.s32.totalorder %s431_s9, %s588_s14  ;;  %s592_s15 = sshll.u32 %s669_s21, 4  ;;  %s593_s15 = int_to_ptr.vmem [resolvable:$false] %s592_s15 }
  0x19   : > { %520 = vmatpush3.msk.msra.mxu0 %vm257_vm1, %v245_v5  ;;  %s594_s16 = scalar_lea.vmem %s593_s15, 256  ;;  %p595_p1 = scmp.lt.s32.totalorder %s431_s9, %s593_s15 }
  0x1a   : > { %522 = vmatmul.mubr.msk.f32.vlgmr.msra.gmra.mxu0 %vm253_vm2, %v246_v4  ;;  %p590_p13 = pnand %p589_p12, %p740_p4  ;;  %p596_p2 = scmp.lt.s32.totalorder %s594_s16, %s588_s14 }
  0x1b   : > { %336 = vperm.xlu0 %587, %v333_v3  }
  0x1c   : > { %p591_p0 = pneg %p590_p13  ;;  %p597_p3 = por %p596_p2, %p595_p1 }
  0x1e   : > { %p598_p5 = pnand %p597_p3, %p591_p0 }
  0x92   : > { %v251_v6 = vpop.permute.xlu0 %250 }
  0x96   : > { %v337_v12 = vpop.permute.xlu0 %336 }
  0xda   : > { %v327_v7 = vpop.f32.mrf.mxu0 }
  0xdb   : > { %v328_v8 = vadd.f32 %v327_v7, %v251_v6 }
  0xdc   : > { %v523_v9 = vpop.f32.mrf.mxu0 }
  0xdd   : > { %v331_v10 = vmax.f32 %v328_v8, 0.0 }
  0xdf   : > { %525 = vmatpush3.msra.mxu1 %v331_v10 }
  0xe0   : > { %527 = vmatmul.mubr.msk.f32.vlgmr.msra.gmra.mxu1 %vm339_vm3, %v332_v11 }
 0x1a0   : > { %v409_v13 = vpop.f32.mrf.mxu1 }
 0x1a1   : > { %v410_v14 = vadd.f32 %v409_v13, %v337_v12 }
 0x1a2   : > { %v528_v15 = vpop.f32.mrf.mxu1 }
 0x1a3   : > { %414 = vst.msk [vmem:[%s237_s8] sm:$0xff] %vm413_vm4, %v410_v14 }
 0x1a4   : > { %601 = shalt.err (!%p598_p5)
}
 0x1a5   : > { %s602_s17 = scalar_lea.hbm %s777_s12, 128  ;;  %s606_s27 = scalar_lea.hbm %s822_s5, 256 }
 0x1a6   : > { %p603_p6 = scmp.ne.s32.totalorder %s777_s12, %s602_s17  ;;  %p607_p10 = scmp.lt.s32.totalorder %s777_s12, %s822_s5 }
 0x1a7   : > { %p608_p11 = scmp.lt.s32.totalorder %s606_s27, %s602_s17 }
 0x1a8   : > { %p604_p7 = pnand %p603_p6, %p740_p4 }
 0x1a9   : > { %p609_p12 = por %p608_p11, %p607_p10 }
 0x1aa   : > { %p605_p9 = pneg %p604_p7 }
 0x1ac   : > { %p610_p13 = pnand %p609_p12, %p605_p9 }
 0x1ae   : > { %613 = shalt.err (!%p610_p13)
}
 0x1af   : > { %529 = dma.vmem_to_hbm [thread:$0]  (%p740_p4), %s431_s9, 128, %s777_s12, %s416_s13  }
 0x1b0 PF: > { %p535_p0 = scmp.ge.s32.totalorder %s664_s23, 2  ;;  %s442_s8 = sand.u32 1, %s644_s18  }
 0x1b1   : > { %s443_s10 = scalar_lea.sflag [#allocation3], %s442_s8 }
 0x1b2   : > { %p532_p1 = pnand %p535_p0, %p747_p8 }
 0x1b4   : > { %p533_p2 = pneg %p532_p1 }
 0x1b6   : > { %639 = dma.done.wait (%p533_p2), %s443_s10, 128  }
 0x1b7   : > { %641 = vsyncadd (%p533_p2), %s443_s10, 4294967168  ;;  %s18_s23 = sadd.s32 1, %s664_s23   ;;  %s825_s18 = smov %s648_s19 }
 0x1b8   : > { %p15_p3 = scmp.ge.s32.totalorder %s18_s23, 4   ;;  %s826_s19 = smov %s652_s20 }
 0x1b9   : > { %s827_s20 = smov %s753_s6  ;;  %s828_s21 = smov %s660_s22 }
 0x1ba   : > { %s829_s22 = smov %s831_s26  ;;  %17 = sbr.rel (!%p15_p3) target bundleno = 4 (0x4), region = 75 }
 0x1bf   :  { %448 = vsyncpa [#allocation3], 1 }
 0x1c0   :  { %450 = vsyncpa [#allocation3 + $0x1], 1 }

</bundles_post_ra>
